<compile_context>
chip_gen: v7x
topology: tpu7x:2x2x1
jax: 0.10.0
libtpu: 0.0.40
codegen_flags: <defaults>
</compile_context>

<pallas_src>
import jax
import jax.numpy as jnp
from jax.experimental import pallas as pl
from jax.experimental.pallas import tpu as pltpu


def _const_broadcast_kernel(const_ref, o_ref):
    # const_ref: (1, F)  flattened learned constant (F = C*S*S), resident block
    # o_ref:     (TB, F) lane-dense output tile covering TB batch rows
    o_ref[...] = jnp.broadcast_to(const_ref[...], o_ref.shape)


def constant_input_forward(x, const_param, *, target_block_bytes=4 * 1024 * 1024):
    """Replicates ConstantInput.forward.

    x:           any array whose leading dim is the batch size (values unused)
    const_param: (1, C, S, S) learned constant
    returns:     (B, C, S, S) = const_param repeated over batch
    """
    batch = x.shape[0]
    _, c, s1, s2 = const_param.shape
    f = c * s1 * s2

    # Lane-dense view of the constant: (1, F).
    const_flat = const_param.reshape(1, f)
    itemsize = jnp.dtype(const_param.dtype).itemsize

    # Batch-tile sizing: amortize per-grid-step overhead with multi-MiB output
    # blocks while staying well under default scoped VMEM (2 output buffers +
    # the tiny resident constant).
    tb = max(1, target_block_bytes // max(1, f * itemsize))
    if tb >= batch:
        # Single block over the full batch: full-extent dims are always legal.
        tb = batch
    else:
        # Sub-batch blocks: keep the sublane (second-to-last) dim a multiple of 8.
        tb = max(8, (tb // 8) * 8)
        tb = min(tb, batch)

    grid = (pl.cdiv(batch, tb),)

    out_flat = pl.pallas_call(
        _const_broadcast_kernel,
        out_shape=jax.ShapeDtypeStruct((batch, f), const_param.dtype),
        grid=grid,
        in_specs=[
            # Same (single) constant block for every grid step -> stays resident.
            pl.BlockSpec((1, f), lambda b: (0, 0)),
        ],
        out_specs=pl.BlockSpec((tb, f), lambda b: (b, 0)),
        compiler_params=pltpu.CompilerParams(
            dimension_semantics=("parallel",),
        ),
    )(const_flat)

    return out_flat.reshape(batch, c, s1, s2)


if __name__ == "__main__":
    key = jax.random.PRNGKey(0)
    k_param, k_x = jax.random.split(key)

    channel = 4
    size = 4
    batch = 2

    # Deterministic "parameter" init, mirroring torch.randn(1, channel, size, size).
    const_param = jax.random.normal(
        k_param, (1, channel, size, size), dtype=jnp.float32
    )

    # The forward only reads input.shape[0]; values are irrelevant.
    x = jax.random.normal(k_x, (batch, channel, 16, 16), dtype=jnp.float32)

    out = constant_input_forward(x, const_param)
    out = jax.block_until_ready(out)

    # Reference check: out == const_param broadcast over batch.
    ref = jnp.broadcast_to(const_param, (batch, channel, size, size))
    assert out.shape == (batch, channel, size, size)
    assert jnp.array_equal(out, ref)

    print("KERNEL_OK")
</pallas_src>

<mosaic_0001>
module attributes {stable_mosaic.version = 11 : i64} {
  func.func @_const_broadcast_kernel(%arg0: i32, %arg1: memref<1x64xf32, #tpu.memory_space<vmem>>, %arg2: memref<2x64xf32, #tpu.memory_space<vmem>>) attributes {dimension_semantics = [#tpu.dimension_semantics<parallel>], iteration_bounds = array<i64: 1>, scalar_prefetch = 0 : i64, scratch_operands = 0 : i64, tpu.core_type = #tpu.core_type<tc>, window_params = [{pipeline_mode = #tpu.pipeline_mode<synchronous>, transform_indices = @transform_0, window_bounds = array<i64: 1, 64>}, {transform_indices = @transform_1, window_bounds = array<i64: 2, 64>}]} {
    %c0 = arith.constant 0 : index
    %c0_0 = arith.constant 0 : index
    %0 = vector.load %arg1[%c0, %c0_0] : memref<1x64xf32, #tpu.memory_space<vmem>>, vector<1x64xf32>
    %1 = vector.shape_cast %0 : vector<1x64xf32> to vector<1x64xf32>
    %2 = vector.broadcast %1 : vector<1x64xf32> to vector<2x64xf32>
    %c0_1 = arith.constant 0 : index
    %c0_2 = arith.constant 0 : index
    %3 = vector.load %arg2[%c0_1, %c0_2] : memref<2x64xf32, #tpu.memory_space<vmem>>, vector<2x64xf32>
    tpu.vector_store %arg2[%c0_1, %c0_2], %2 {strides = array<i32>} : memref<2x64xf32, #tpu.memory_space<vmem>>, vector<2x64xf32>,
    return
  }
  func.func @transform_0(%arg0: i32) -> (i32, i32) {
    %c0_i32 = arith.constant 0 : i32
    %c0_i32_0 = arith.constant 0 : i32
    %c0_i32_1 = arith.constant 0 : i32
    return %c0_i32, %c0_i32_0 : i32, i32
  }
  func.func @transform_1(%arg0: i32) -> (i32, i32) {
    %c0_i32 = arith.constant 0 : i32
    %c0_i32_0 = arith.constant 0 : i32
    return %arg0, %c0_i32 : i32, i32
  }
}

</mosaic_0001>

<bundles_post_ra>
// kernel: tpu_custom_call.1
= control target key start
LH: loop header
LB: loop body
LE: loop exit
PB: predicated region body
PF: predicated region fallthrough
CT: control target
= control target key end

     0   :  { %6 = vsyncpa [#allocation3], 0  ;;  %s132_s0 = inlined_call_operand.hbm [shape: f32[1,64], index: 0, kind: input, shape index: {}]   ;;  %s133_s1 = inlined_call_operand.hbm [shape: f32[2,64], index: 1, kind: output, shape index: {}]  }
   0x1   :  { %7 = vsyncpa [#allocation4], 0  ;;  %s96_s6 = smov [#allocation2]   ;;  %s48_s10 = scalar_lea.hbm %s132_s0, 16 }
   0x2   :  { %s14_s7 = sshll.u32 %s96_s6, 4  ;;  %p49_p0 = scmp.ne.s32.totalorder %s132_s0, %s48_s10  ;;  %s15_s7 = int_to_ptr.vmem [resolvable:$true] %s14_s7 }
   0x3   :  { %p52_p1 = scmp.lt.u32.totalorder %s48_s10, %s132_s0 }
   0x5   :  { %p54_p2 = pnand %p52_p1, %p49_p0 }
   0x7   :  { %57 = shalt.err (!%p54_p2)
}
   0x8   :  { %s58_s15 = scalar_lea.vmem %s15_s7, 16  ;;  %s62_s16 = scalar_lea.vmem %s15_s7, 32 }
   0x9   :  { %p59_p3 = scmp.ne.s32.totalorder %s15_s7, %s58_s15  ;;  %p63_p4 = scmp.lt.s32.totalorder %s15_s7, %s15_s7 }
   0xa   :  { %p64_p5 = scmp.lt.s32.totalorder %s62_s16, %s58_s15 }
   0xc   :  { %p65_p6 = por %p64_p5, %p63_p4 }
   0xe   :  { %p66_p7 = pnand %p65_p6, %p59_p3 }
  0x10   :  { %69 = shalt.err (!%p66_p7)
}
  0x11   :  { %17 = dma.hbm_to_vmem [thread:$0]  %s132_s0, 16, %s15_s7, [#allocation3]  }
  0x12   :  { %92 = dma.done.wait [#allocation3], 16  }
  0x13   :  { %93 = vsyncadd [#allocation3], 4294967280  ;;  %s97_s19 = smov [#allocation5]   ;;  %vm28_vm0 = vcmask 517120   ;;  %v45_v0 = vld [vmem:[#allocation2] ss:$0 sm:$0xff] }
  0x14   :  { %s36_s20 = sshll.u32 %s97_s19, 4  ;;  %29 = vst.msk [vmem:[#allocation5] sm:$0x3] %vm28_vm0, %v45_v0  ;;  %s37_s20 = int_to_ptr.vmem [resolvable:$true] %s36_s20 }
  0x15   :  { %s70_s21 = scalar_lea.vmem %s37_s20, 32  ;;  %p75_p9 = scmp.lt.s32.totalorder %s37_s20, %s37_s20 }
  0x16   :  { %p71_p8 = scmp.ne.s32.totalorder %s37_s20, %s70_s21  ;;  %p76_p10 = scmp.lt.s32.totalorder %s70_s21, %s70_s21 }
  0x18   :  { %p77_p11 = por %p76_p10, %p75_p9 }
  0x1a   :  { %p78_p12 = pnand %p77_p11, %p71_p8 }
  0x1c   :  { %81 = shalt.err (!%p78_p12)
}
  0x1d   :  { %s82_s24 = scalar_lea.hbm %s133_s1, 32 }
  0x1e   :  { %p83_p13 = scmp.ne.s32.totalorder %s133_s1, %s82_s24  ;;  %p86_p0 = scmp.lt.u32.totalorder %s82_s24, %s133_s1 }
  0x20   :  { %p88_p1 = pnand %p86_p0, %p83_p13 }
  0x22   :  { %91 = shalt.err (!%p88_p1)
}
  0x23   :  { %39 = dma.vmem_to_hbm [thread:$0]  %s37_s20, 32, %s133_s1, [#allocation4]  }
  0x24   :  { %94 = dma.done.wait [#allocation4], 32  }
  0x25   :  { %95 = vsyncadd [#allocation4], 4294967264 }
  0x26   :  { %43 = vsyncpa [#allocation3], 1 }
  0x27   :  { %44 = vsyncpa [#allocation4], 1 }

</bundles_post_ra>
